<compile_context>
chip_gen: v7x
topology: tpu7x:2x2x1
jax: 0.10.0
libtpu: 0.0.40
codegen_flags: <defaults>
</compile_context>

<pallas_src>
import jax
import jax.numpy as jnp
import numpy as np
from jax.experimental import pallas as pl
from jax.experimental.pallas import tpu as pltpu


def _noisy_ce_kernel(n_ref, p_ref, logits_ref, targets_ref, out_ref):
    """Processes one (TILE_N, C) logits tile, accumulating into out_ref (8,128)."""
    split = pl.program_id(0)          # "parallel" core-split axis
    step = pl.program_id(1)           # "arbitrary" reduction axis

    @pl.when(step == 0)
    def _():
        out_ref[...] = jnp.zeros_like(out_ref)

    x = logits_ref[...].astype(jnp.float32)     # upcast on vregs, not in HBM
    t = targets_ref[...]                        # (TILE_N, 1) int32
    tile_n, num_classes = x.shape

    # Bool compare against a lane iota replaces any materialized one-hot and
    # feeds the target-logit gather.
    class_ids = jax.lax.broadcasted_iota(jnp.int32, (tile_n, num_classes), 1)
    is_target = class_ids == t                  # (TILE_N, C) bool

    # Numerically stable per-row cross entropy: logsumexp(x) - x[i, t_i].
    m = jnp.max(x, axis=1, keepdims=True)
    lse = m + jnp.log(jnp.sum(jnp.exp(x - m), axis=1, keepdims=True))
    target_logit = jnp.sum(jnp.where(is_target, x, 0.0), axis=1, keepdims=True)
    losses = lse - target_logit                 # (TILE_N, 1)

    # one_hot(t, C).sum(1) == 1 iff 0 <= t < C, so the weight only needs the
    # (TILE_N, 1) targets tile — no N x C reduce.
    p = p_ref[0]
    in_range = jnp.logical_and(t >= 0, t < num_classes).astype(jnp.float32)
    weights = (1.0 - p) + p * (1.0 - in_range)  # (TILE_N, 1)

    # Mask rows past the true batch size: covers the partial trailing logits
    # block and the clamped padding tiles of the last split.  (Select, not
    # multiply-by-mask, so garbage inf/NaN in padded rows never propagates.)
    tiles_per_split = pl.num_programs(1)
    tile_idx = split * tiles_per_split + step
    row = tile_idx * tile_n + jax.lax.broadcasted_iota(jnp.int32, (tile_n, 1), 0)
    contrib = jnp.where(row < n_ref[0], losses * weights, 0.0)

    # Accumulate into the resident (8, 128) output tile (one vreg add).
    out_ref[...] += jnp.sum(contrib)


def _vmem_budget_bytes():
    """Generation-aware VMEM budget (leaves headroom below physical VMEM)."""
    phys = None
    try:
        info = pltpu.get_tpu_info()
        phys = int(getattr(info, "vmem_capacity_bytes"))
    except Exception:
        phys = None
    if phys is None:
        phys = 64 * 1024 * 1024            # conservative default (v7x-sized)
    if phys <= 64 * 1024 * 1024:
        return 48 * 1024 * 1024            # v7x: 64 MiB physical
    return 96 * 1024 * 1024                # v5e / v6e: 128 MiB physical


def _choose_tile_n(n, c, itemsize, vmem_limit):
    """Largest multiple-of-8 row tile that fits the intermediate-aware budget.

    Per-row VMEM cost: double-buffered input block (2 * itemsize per element)
    plus ~3 f32 (TILE_N, C) temporaries (the astype copy, exp(x - m), the
    where/select), plus small slack for targets / accumulator / internals.
    """
    per_row = c * (2 * itemsize + 3 * 4) + 128
    budget = max(per_row * 8, vmem_limit - 4 * 1024 * 1024)
    tile = max(8, budget // per_row)
    tile = (int(tile) // 8) * 8
    if tile >= n:
        return n                            # full-dim block is always legal
    return tile


def noisy_cross_entropy_loss(logits, targets, p_noisy, tile_n=None, num_splits=2):
    """logits: (N, C) float, targets: (N,) int class ids. Returns scalar f32."""
    n, c = logits.shape
    targets_2d = targets.astype(jnp.int32).reshape(n, 1)

    vmem_limit = _vmem_budget_bytes()
    if tile_n is None:
        tile_n = _choose_tile_n(n, c, logits.dtype.itemsize, vmem_limit)
    num_tiles = pl.cdiv(n, tile_n)
    num_splits = max(1, min(num_splits, num_tiles))
    tiles_per_split = pl.cdiv(num_tiles, num_splits)

    def tile_index(s, i):
        # Clamp padding tiles of the last split onto a valid block; their rows
        # are fully masked in the kernel via the global-row check.
        return jnp.minimum(s * tiles_per_split + i, num_tiles - 1)

    n_arr = jnp.asarray([n], dtype=jnp.int32)
    p_arr = jnp.asarray([p_noisy], dtype=jnp.float32)

    out_slab = pl.pallas_call(
        _noisy_ce_kernel,
        out_shape=jax.ShapeDtypeStruct((num_splits * 8, 128), jnp.float32),
        grid_spec=pltpu.PrefetchScalarGridSpec(
            num_scalar_prefetch=2,
            grid=(num_splits, tiles_per_split),
            in_specs=[
                pl.BlockSpec((tile_n, c),
                             lambda s, i, n_ref, p_ref: (tile_index(s, i), 0)),
                pl.BlockSpec((tile_n, 1),
                             lambda s, i, n_ref, p_ref: (tile_index(s, i), 0)),
            ],
            out_specs=pl.BlockSpec((8, 128),
                                   lambda s, i, n_ref, p_ref: (s, 0)),
        ),
        compiler_params=pltpu.CompilerParams(
            dimension_semantics=("parallel", "arbitrary"),
            vmem_limit_bytes=vmem_limit,
        ),
        cost_estimate=pl.CostEstimate(
            flops=4 * n * c,
            transcendentals=n * c + n,
            bytes_accessed=n * c * logits.dtype.itemsize + n * 4
            + num_splits * 8 * 128 * 4,
        ),
    )(n_arr, p_arr, logits, targets_2d)

    # One scalar per split; tiny cross-split reduction + global mean here.
    partials = out_slab.reshape(num_splits, 8, 128)[:, 0, 0]
    return jnp.sum(partials) / n


def _reference(logits, targets, p_noisy):
    # Pure-JAX reference mirroring the PyTorch module.
    x = logits.astype(jnp.float32)
    lse = jax.nn.logsumexp(x, axis=1)
    target_logit = jnp.take_along_axis(
        x, targets[:, None].astype(jnp.int32), axis=1)[:, 0]
    losses = lse - target_logit
    onehot_sum = jax.nn.one_hot(targets, x.shape[1], dtype=jnp.float32).sum(axis=1)
    weights = 1.0 - p_noisy + p_noisy * (1.0 - onehot_sum)
    return jnp.mean(losses * weights)


if __name__ == "__main__":
    key = jax.random.PRNGKey(0)
    p_noisy = 0.2

    # Test 1: small batch, single tile, single split.
    k1, k2, k3, k4 = jax.random.split(key, 4)
    N1, C1 = 8, 32
    logits1 = jax.random.normal(k1, (N1, C1), dtype=jnp.float32)
    targets1 = jax.random.randint(k2, (N1,), 0, C1, dtype=jnp.int32)
    out1 = jax.block_until_ready(noisy_cross_entropy_loss(logits1, targets1, p_noisy))
    ref1 = jax.block_until_ready(_reference(logits1, targets1, p_noisy))
    np.testing.assert_allclose(np.asarray(out1), np.asarray(ref1),
                               rtol=1e-5, atol=1e-5)

    # Test 2: forced small tile -> 2 splits, multiple grid steps, masked
    # partial tail block, and a clamped padding tile on the last split.
    N2, C2 = 20, 32
    logits2 = jax.random.normal(k3, (N2, C2), dtype=jnp.float32)
    targets2 = jax.random.randint(k4, (N2,), 0, C2, dtype=jnp.int32)
    out2 = jax.block_until_ready(
        noisy_cross_entropy_loss(logits2, targets2, p_noisy, tile_n=8))
    ref2 = jax.block_until_ready(_reference(logits2, targets2, p_noisy))
    np.testing.assert_allclose(np.asarray(out2), np.asarray(ref2),
                               rtol=1e-5, atol=1e-5)

    print("KERNEL_OK")
</pallas_src>

<mosaic_0001>
module attributes {stable_mosaic.version = 11 : i64} {
  func.func @_noisy_ce_kernel(%arg0: i32, %arg1: i32, %arg2: memref<1xi32, #tpu.memory_space<smem>>, %arg3: memref<1xf32, #tpu.memory_space<smem>>, %arg4: memref<8x32xf32, #tpu.memory_space<vmem>>, %arg5: memref<8x1xi32, #tpu.memory_space<vmem>>, %arg6: memref<8x128xf32, #tpu.memory_space<vmem>>) attributes {dimension_semantics = [#tpu.dimension_semantics<parallel>, #tpu.dimension_semantics<arbitrary>], iteration_bounds = array<i64: 1, 1>, scalar_prefetch = 2 : i64, scratch_operands = 0 : i64, tpu.core_type = #tpu.core_type<tc>, window_params = [{transform_indices = @transform_0, window_bounds = array<i64: 8, 32>}, {transform_indices = @transform_1, window_bounds = array<i64: 8, 1>}, {transform_indices = @transform_2, window_bounds = array<i64: 8, 128>}]} {
    %c0_i32 = arith.constant 0 : i32
    %0 = arith.cmpi eq, %arg1, %c0_i32 : i32
    %1 = arith.extui %0 : i1 to i32
    %c0_i32_0 = arith.constant 0 : i32
    %2 = arith.cmpi ne, %1, %c0_i32_0 : i32
    scf.if %2 {
      %cst_18 = arith.constant 0.000000e+00 : f32
      %57 = vector.broadcast %cst_18 : f32 to vector<8x128xf32>
      %c0_19 = arith.constant 0 : index
      %c0_20 = arith.constant 0 : index
      %58 = vector.load %arg6[%c0_19, %c0_20] : memref<8x128xf32, #tpu.memory_space<vmem>>, vector<8x128xf32>
      tpu.vector_store %arg6[%c0_19, %c0_20], %57 {strides = array<i32>} : memref<8x128xf32, #tpu.memory_space<vmem>>, vector<8x128xf32>,
    } else {
    }
    %c0 = arith.constant 0 : index
    %c0_1 = arith.constant 0 : index
    %3 = vector.load %arg4[%c0, %c0_1] : memref<8x32xf32, #tpu.memory_space<vmem>>, vector<8x32xf32>
    %c0_2 = arith.constant 0 : index
    %c0_3 = arith.constant 0 : index
    %4 = vector.load %arg5[%c0_2, %c0_3] : memref<8x1xi32, #tpu.memory_space<vmem>>, vector<8x1xi32>
    %5 = tpu.iota {dimensions = array<i32: 1>} : vector<8x32xi32>
    %6 = vector.broadcast %4 : vector<8x1xi32> to vector<8x32xi32>
    %7 = arith.cmpi eq, %5, %6 : vector<8x32xi32>
    %cst = arith.constant dense<0xFF800000> : vector<8xf32>
    %8 = vector.multi_reduction <maximumf>, %3, %cst [1] : vector<8x32xf32> to vector<8xf32>
    %9 = vector.shape_cast %8 : vector<8xf32> to vector<8x1xf32>
    %10 = vector.broadcast %9 : vector<8x1xf32> to vector<8x32xf32>
    %11 = arith.subf %3, %10 : vector<8x32xf32>
    %12 = math.exp %11 : vector<8x32xf32>
    %cst_4 = arith.constant dense<0.000000e+00> : vector<8xf32>
    %13 = vector.multi_reduction <add>, %12, %cst_4 [1] : vector<8x32xf32> to vector<8xf32>
    %14 = vector.shape_cast %13 : vector<8xf32> to vector<8x1xf32>
    %15 = math.log %14 : vector<8x1xf32>
    %16 = arith.addf %9, %15 : vector<8x1xf32>
    %cst_5 = arith.constant 0.000000e+00 : f32
    %17 = vector.broadcast %cst_5 : f32 to vector<8x32xf32>
    %18 = arith.select %7, %3, %17 : vector<8x32xi1>, vector<8x32xf32>
    %cst_6 = arith.constant dense<0.000000e+00> : vector<8xf32>
    %19 = vector.multi_reduction <add>, %18, %cst_6 [1] : vector<8x32xf32> to vector<8xf32>
    %20 = vector.shape_cast %19 : vector<8xf32> to vector<8x1xf32>
    %21 = arith.subf %16, %20 : vector<8x1xf32>
    %c0_7 = arith.constant 0 : index
    %22 = memref.load %arg3[%c0_7] : memref<1xf32, #tpu.memory_space<smem>>
    %c0_i32_8 = arith.constant 0 : i32
    %23 = vector.broadcast %c0_i32_8 : i32 to vector<8x1xi32>
    %24 = arith.cmpi sge, %4, %23 : vector<8x1xi32>
    %c32_i32 = arith.constant 32 : i32
    %25 = vector.broadcast %c32_i32 : i32 to vector<8x1xi32>
    %26 = arith.cmpi slt, %4, %25 : vector<8x1xi32>
    %27 = arith.andi %24, %26 : vector<8x1xi1>
    %28 = arith.extui %27 : vector<8x1xi1> to vector<8x1xi32>
    %29 = arith.sitofp %28 : vector<8x1xi32> to vector<8x1xf32>
    %cst_9 = arith.constant 1.000000e+00 : f32
    %30 = arith.subf %cst_9, %22 : f32
    %cst_10 = arith.constant 1.000000e+00 : f32
    %31 = vector.broadcast %cst_10 : f32 to vector<8x1xf32>
    %32 = arith.subf %31, %29 : vector<8x1xf32>
    %33 = vector.broadcast %22 : f32 to vector<8x1xf32>
    %34 = arith.mulf %33, %32 : vector<8x1xf32>
    %35 = vector.broadcast %30 : f32 to vector<8x1xf32>
    %36 = arith.addf %35, %34 : vector<8x1xf32>
    %c1_i32 = arith.constant 1 : i32
    %37 = arith.muli %arg0, %c1_i32 : i32
    %38 = arith.addi %37, %arg1 : i32
    %c8_i32 = arith.constant 8 : i32
    %39 = arith.muli %38, %c8_i32 : i32
    %40 = tpu.iota {dimensions = array<i32: 0>} : vector<8x1xi32>
    %41 = vector.broadcast %39 : i32 to vector<8x1xi32>
    %42 = arith.addi %41, %40 : vector<8x1xi32>
    %c0_11 = arith.constant 0 : index
    %43 = memref.load %arg2[%c0_11] : memref<1xi32, #tpu.memory_space<smem>>
    %44 = vector.broadcast %43 : i32 to vector<8x1xi32>
    %45 = arith.cmpi slt, %42, %44 : vector<8x1xi32>
    %46 = arith.mulf %21, %36 : vector<8x1xf32>
    %cst_12 = arith.constant 0.000000e+00 : f32
    %47 = vector.broadcast %cst_12 : f32 to vector<8x1xf32>
    %48 = arith.select %45, %46, %47 : vector<8x1xi1>, vector<8x1xf32>
    %c0_13 = arith.constant 0 : index
    %c0_14 = arith.constant 0 : index
    %49 = vector.load %arg6[%c0_13, %c0_14] : memref<8x128xf32, #tpu.memory_space<vmem>>, vector<8x128xf32>
    %50 = vector.shape_cast %48 : vector<8x1xf32> to vector<1x8x1xf32>
    %cst_15 = arith.constant dense<0.000000e+00> : vector<1xf32>
    %51 = vector.multi_reduction <add>, %50, %cst_15 [1, 2] : vector<1x8x1xf32> to vector<1xf32>
    %52 = vector.shape_cast %51 : vector<1xf32> to vector<1x1x1xf32>
    %53 = vector.extract %52[0, 0, 0] : f32 from vector<1x1x1xf32>
    %54 = vector.broadcast %53 : f32 to vector<8x128xf32>
    %55 = arith.addf %49, %54 : vector<8x128xf32>
    %c0_16 = arith.constant 0 : index
    %c0_17 = arith.constant 0 : index
    %56 = vector.load %arg6[%c0_16, %c0_17] : memref<8x128xf32, #tpu.memory_space<vmem>>, vector<8x128xf32>
    tpu.vector_store %arg6[%c0_16, %c0_17], %55 {strides = array<i32>} : memref<8x128xf32, #tpu.memory_space<vmem>>, vector<8x128xf32>,
    return
  }
  func.func @transform_0(%arg0: i32, %arg1: i32, %arg2: memref<1xi32, #tpu.memory_space<smem>>, %arg3: memref<1xf32, #tpu.memory_space<smem>>) -> (i32, i32) {
    %c1_i32 = arith.constant 1 : i32
    %0 = arith.muli %arg0, %c1_i32 : i32
    %1 = arith.addi %0, %arg1 : i32
    %c0_i32 = arith.constant 0 : i32
    %2 = arith.minsi %1, %c0_i32 : i32
    %c0_i32_0 = arith.constant 0 : i32
    %c0_i32_1 = arith.constant 0 : i32
    return %2, %c0_i32_0 : i32, i32
  }
  func.func @transform_1(%arg0: i32, %arg1: i32, %arg2: memref<1xi32, #tpu.memory_space<smem>>, %arg3: memref<1xf32, #tpu.memory_space<smem>>) -> (i32, i32) {
    %c1_i32 = arith.constant 1 : i32
    %0 = arith.muli %arg0, %c1_i32 : i32
    %1 = arith.addi %0, %arg1 : i32
    %c0_i32 = arith.constant 0 : i32
    %2 = arith.minsi %1, %c0_i32 : i32
    %c0_i32_0 = arith.constant 0 : i32
    %c0_i32_1 = arith.constant 0 : i32
    return %2, %c0_i32_0 : i32, i32
  }
  func.func @transform_2(%arg0: i32, %arg1: i32, %arg2: memref<1xi32, #tpu.memory_space<smem>>, %arg3: memref<1xf32, #tpu.memory_space<smem>>) -> (i32, i32) {
    %c0_i32 = arith.constant 0 : i32
    %c0_i32_0 = arith.constant 0 : i32
    return %arg0, %c0_i32 : i32, i32
  }
}

</mosaic_0001>

<bundles_post_ra>
// kernel: tpu_custom_call.1
= control target key start
LH: loop header
LB: loop body
LE: loop exit
PB: predicated region body
PF: predicated region fallthrough
CT: control target
= control target key end

     0   :  { %vm83_vm0 = vcmask 261120   ;;  %v200_v2 = vmov 0   ;;  %s258_s0 = inlined_call_operand.<no memory space> [shape: s32[1], index: 0, kind: input, shape index: {}]   ;;  %s259_s1 = inlined_call_operand.<no memory space> [shape: f32[1], index: 1, kind: input, shape index: {}]   ;;  %s260_s2 = inlined_call_operand.vmem [shape: f32[8,32], index: 2, kind: input, shape index: {}]   ;;  %s261_s3 = inlined_call_operand.vmem [shape: s32[8,1], index: 3, kind: input, shape index: {}]   ;;  %s262_s4 = inlined_call_operand.hbm [shape: f32[8,128], index: 4, kind: output, shape index: {}]  }
   0x1   :  { %v75_v0 = vld [vmem:[%s260_s2] sm:$0xff]  ;;  %171 = vset.pattern.permute.xlu0 %v200_v2 }
   0x2   :  { %v84_v1 = vsel %vm83_vm0, %v75_v0, -inf }
   0x3   :  { %11 = vsyncpa [#allocation6], 0  ;;  %85 = vmax.xlane.f32.xlu0 %v84_v1  ;;  %v76_v3 = vld [vmem:[%s261_s3] sm:$0xff]  ;;  %v77_v7 = vlaneseq  ;;  %v201_v15 = vmov 0.0   ;;  %s107_s19 = ssub.f32 1.0, %s259_s1  ;;  %v109_v18 = vstv %s259_s1  ;;  %v120_v27 = vstv %s258_s0  ;;  %s202_s1 = smov [#allocation5]  }
   0x4   :  { %vm102_vm2 = vcmp.ge.s32.totalorder %v76_v3, 0  ;;  %vm103_vm3 = vcmp.lt.s32.totalorder %v76_v3, 32  ;;  %vm125_vm6 = vcmask 7168   ;;  %s145_s24 = sshll.u32 %s202_s1, 4  ;;  %s146_s24 = int_to_ptr.vmem [resolvable:$true] %s145_s24 }
   0x5   :  { %v78_v8 = vand.u32 127, %v77_v7  ;;  %vm104_vm4 = vmand %vm102_vm2, %vm103_vm3  ;;  %v111_v21 = vstv %s107_s19  ;;  %v116_v24 = vshrl.u32 %v77_v7, 7  ;;  %s176_s0 = scalar_lea.vmem %s146_s24, 128  ;;  %p181_p1 = scmp.lt.s32.totalorder %s146_s24, %s146_s24 }
   0x6   :  { %v165_v16 = vsel %vm104_vm4, 1.0, %v201_v15  ;;  %p177_p0 = scmp.ne.s32.totalorder %s146_s24, %s176_s0  ;;  %p182_p2 = scmp.lt.s32.totalorder %s176_s0, %s176_s0 }
   0x7   :  { %v108_v17 = vsub.f32 1.0, %v165_v16  ;;  %vm121_vm5 = vcmp.lt.s32.totalorder %v116_v24, %v120_v27 }
   0x8   :  { %p183_p3 = por %p182_p2, %p181_p1 }
   0x9   :  { %v110_v19 = vmul.f32 %v109_v18, %v108_v17 }
   0xa   :  { %p184_p4 = pnand %p183_p3, %p177_p0 }
   0xb   :  { %v112_v26 = vadd.f32 %v111_v21, %v110_v19 }
  0x19   :  { %80 = vperm.xlu0 %171, %v76_v3  }
  0x90   :  { %v86_v4 = vpop.xlane.xlu0 %85 }
  0x91   :  { %v87_v5 = vsub.f32 %v75_v0, %v86_v4 }
  0x93   :  { %v88_v6 = vmul.f32 1.442695, %v87_v5 }
  0x95   :  { %172 = vpow2.f32 %v88_v6 }
  0x98   :  { %v81_v9 = vpop.permute.xlu0 %80 }
  0x99   :  { %vm82_vm1 = vcmp.eq.s32.totalorder %v78_v8, %v81_v9 }
  0x9a   :  { %v96_v11 = vsel %vm82_vm1, %v75_v0, 0.0 }
  0x9b   :  { %v97_v13 = vsel %vm83_vm0, %v96_v11, 0.0 }
  0x9f   :  { %v173_v10 = vpop.eup %172 }
  0xa0   :  { %v90_v12 = vsel %vm83_vm0, %v173_v10, 0.0 }
  0xa1   :  { %91 = vadd.xlane.f32.xlu1 %v90_v12 }
  0xa5   :  { %98 = vadd.xlane.f32.xlu1 %v97_v13 }
 0x12e   :  { %v92_v14 = vpop.xlane.xlu1 %91 }
 0x12f   :  { %174 = vlog2.f32 %v92_v14 }
 0x132   :  { %v99_v23 = vpop.xlane.xlu1 %98 }
 0x139   :  { %v175_v20 = vpop.eup %174 }
 0x13a   :  { %v94_v22 = vmul.f32 0.6931472, %v175_v20 }
 0x13c   :  { %v95_v25 = vadd.f32 %v94_v22, %v86_v4 }
 0x13e   :  { %v100_v28 = vsub.f32 %v95_v25, %v99_v23 }
 0x140   :  { %v122_v29 = vmul.f32 %v112_v26, %v100_v28 }
 0x142   :  { %v123_v30 = vsel %vm121_vm5, %v122_v29, 0.0 }
 0x143   :  { %v126_v31 = vsel %vm125_vm6, %v123_v30, 0.0 }
 0x144   :  { %127 = vadd.xlane.f32.xlu1 %v126_v31 }
 0x1d1   :  { %v128_v32 = vpop.xlane.xlu1 %127 }
 0x1d2   :  { %v129_v33 = vrot.slane %v128_v32, 4 }
 0x1d4   :  { %v130_v34 = vadd.f32 %v129_v33, %v128_v32 }
 0x1d6   :  { %v131_v35 = vrot.slane %v130_v34, 2 }
 0x1d8   :  { %v132_v36 = vadd.f32 %v131_v35, %v130_v34 }
 0x1da   :  { %v133_v37 = vrot.slane %v132_v36, 1 }
 0x1dc   :  { %v134_v38 = vadd.f32 %v133_v37, %v132_v36 }
 0x1de   :  { %166 = vpush %v134_v38 }
 0x20f   :  { %s167_s25 = spop %166 }
 0x210   :  { %v136_v39 = vstv %s167_s25 }
 0x211   :  { %138 = vst [vmem:[#allocation5] sm:$0xff] %v136_v39 }
 0x212   :  { %187 = shalt.err (!%p184_p4)
}
 0x213   :  { %s188_s28 = scalar_lea.hbm %s262_s4, 128 }
 0x214   :  { %p189_p5 = scmp.ne.s32.totalorder %s262_s4, %s188_s28  ;;  %p192_p6 = scmp.lt.u32.totalorder %s188_s28, %s262_s4 }
 0x216   :  { %p194_p7 = pnand %p192_p6, %p189_p5 }
 0x218   :  { %197 = shalt.err (!%p194_p7)
}
 0x219   :  { %148 = dma.vmem_to_hbm [thread:$0]  %s146_s24, 128, %s262_s4, [#allocation6]  }
 0x21a   :  { %198 = dma.done.wait [#allocation6], 128  }
 0x21b   :  { %199 = vsyncadd [#allocation6], 4294967168 }
 0x21c   :  { %152 = vsyncpa [#allocation6], 1 }

</bundles_post_ra>
